<compile_context>
chip_gen: v7x
topology: tpu7x:2x2x1
jax: 0.10.0
libtpu: 0.0.40
codegen_flags: <defaults>
</compile_context>

<pallas_src>
import functools

import jax
import jax.numpy as jnp
from jax.experimental import pallas as pl
from jax.experimental.pallas import tpu as pltpu


def _round_up(x: int, m: int) -> int:
    return (x + m - 1) // m * m


def _vmem_capacity_bytes() -> int:
    """Physical per-core VMEM; conservative (v7x-sized) default if the query fails."""
    try:
        return int(pltpu.get_tpu_info().vmem_capacity_bytes)
    except Exception:
        return 64 << 20


def _pick_batch_block(n, c_in, c_out, h_out, w_blk, w_out, itemsize, budget):
    """Images per grid step.

    Big enough to amortize the ~0.35us per-step overhead and give long DMA
    bursts, small enough that the double-buffered I/O blocks plus in-kernel
    temporaries (~1 extra input block) fit the budget, and capped so v7x's two
    TensorCores each get >= 2 pipelined steps when N allows it.
    """
    def img_bytes(ch, hh, ww):
        return ch * _round_up(hh, 8) * _round_up(ww, 128) * itemsize

    per_img = 3 * img_bytes(c_in, h_out, w_blk) + 2 * img_bytes(c_out, h_out, w_out)
    nb = max(1, min(n, budget // per_img))
    if n >= 4:
        nb = min(nb, max(1, n // 4))      # >= 2 steps per core on v7x
    elif n >= 2:
        nb = min(nb, max(1, n // 2))      # >= 2 steps total: overlap in/out DMA
    return int(nb), int(per_img)


def _make_kernel(pad, c_in, h_out, w_even, w_out, w_blk):
    def kernel(sel_ref, x_ref, o_ref):
        nb = x_ref.shape[0]
        x = x_ref[...]                                   # (nb, C, H/2, w_blk)
        if w_blk != w_even:
            # Fallback path: the block carries both rows of each H pair fused
            # into the lane dim; the even row is the first w_even lanes.
            x = x[:, :, :, :w_even]
        # Stride-2 W subsample as a 0/1 selection matmul on the otherwise-idle
        # MXU.  precision=HIGHEST makes the f32 pass-through exact.
        xs = jnp.dot(x.reshape(nb * c_in * h_out, w_even), sel_ref[...],
                     precision=jax.lax.Precision.HIGHEST,
                     preferred_element_type=jnp.float32)
        xs = xs.reshape(nb, c_in, h_out, w_out).astype(o_ref.dtype)

        # Each output element is written exactly once; all three stores slice
        # only the channel dim (leading, non-lane) -> no masked partial stores.
        if pad > 0:
            z = jnp.zeros((nb, pad, h_out, w_out), o_ref.dtype)
            o_ref[:, :pad, :, :] = z
            o_ref[:, pad + c_in:, :, :] = z
        o_ref[:, pad:pad + c_in, :, :] = xs

    return kernel


@functools.partial(jax.jit, static_argnames=("planes", "skip_odd_rows"))
def _lambda_call(x, *, planes, skip_odd_rows):
    n, c, h, w = x.shape
    assert h % 2 == 0 and w % 2 == 0, "option-A shortcut expects even H, W"
    pad = planes // 4
    c_out = c + 2 * pad
    h_out, w_out = h // 2, w // 2
    itemsize = jnp.dtype(x.dtype).itemsize

    # Generation-aware VMEM budget (v5e/v6e: 128 MiB physical, v7x: 64 MiB).
    vmem_cap = _vmem_capacity_bytes()
    budget = min(24 << 20, vmem_cap // 3)

    w_blk = w if skip_odd_rows else 2 * w
    nb, per_img = _pick_batch_block(n, c, c_out, h_out, w_blk, w_out, itemsize, budget)
    grid = pl.cdiv(n, nb)                 # ragged last block is masked by Pallas

    vmem_limit = int(min(vmem_cap * 3 // 4,
                         max(32 << 20, nb * per_img + (4 << 20))))

    # Free row-major reinterpretation: row pair (2j, 2j+1) of each (n, c) plane
    # is fused into one row of width 2W; the even row is its first W lanes.
    x_r = x.reshape(n, c, h_out, 2 * w)

    # 0/1 selection matrix for the stride-2 W subsample, built once and fed as
    # a resident input (constant index_map) instead of being re-materialized
    # inside every grid step.
    sel = (jnp.arange(w, dtype=jnp.int32)[:, None]
           == 2 * jnp.arange(w_out, dtype=jnp.int32)[None, :]).astype(x.dtype)

    return pl.pallas_call(
        _make_kernel(pad, c, h_out, w, w_out, w_blk),
        out_shape=jax.ShapeDtypeStruct((n, c_out, h_out, w_out), x.dtype),
        grid=(grid,),
        in_specs=[
            pl.BlockSpec((w, w_out), lambda i: (0, 0)),              # sel (resident)
            pl.BlockSpec((nb, c, h_out, w_blk), lambda i: (i, 0, 0, 0)),
        ],
        out_specs=pl.BlockSpec((nb, c_out, h_out, w_out), lambda i: (i, 0, 0, 0)),
        # TODO(synk): if a v7x trace still shows exposed input DMA, add
        # pipeline_mode=pl.Buffered(3) on the input spec (costs one extra
        # input block of the 64 MiB VMEM).
        compiler_params=pltpu.CompilerParams(
            dimension_semantics=("parallel",),
            vmem_limit_bytes=vmem_limit),
    )(sel, x_r)


# (shape, dtype, planes) -> whether the halved-row input block compiled OK.
_PATH_CACHE = {}


def lambda_layer(x_nchw: jax.Array, planes: int) -> jax.Array:
    """ResNet32 option-A shortcut lambda. Input and output are NCHW."""
    key = (tuple(x_nchw.shape), str(x_nchw.dtype), int(planes))
    if _PATH_CACHE.get(key, True):
        try:
            out = _lambda_call(x_nchw, planes=planes, skip_odd_rows=True)
            out = jax.block_until_ready(out)
            _PATH_CACHE[key] = True
            return out
        except Exception:
            # Toolchain rejected the sub-row (last-dim < 128, non-full) input
            # block: fall back to full-width blocks + in-kernel even-row slice
            # (previously validated path; it reads the odd rows it discards).
            _PATH_CACHE[key] = False
    return _lambda_call(x_nchw, planes=planes, skip_odd_rows=False)


if __name__ == "__main__":
    key = jax.random.PRNGKey(0)
    N, C, H, W = 2, 4, 16, 16
    planes = 8  # shortcut target width: out channels = C + 2 * (planes // 4) = 8

    x = jax.random.normal(key, (N, C, H, W), dtype=jnp.float32)

    out = jax.block_until_ready(lambda_layer(x, planes))

    # Pure-JAX reference of the PyTorch lambda:
    #   F.pad(x[:, :, ::2, ::2], (0, 0, 0, 0, planes // 4, planes // 4))
    pad = planes // 4
    ref = jnp.pad(x[:, :, ::2, ::2], ((0, 0), (pad, pad), (0, 0), (0, 0)))

    assert out.shape == ref.shape, (out.shape, ref.shape)
    assert out.dtype == ref.dtype
    assert jnp.allclose(out, ref), float(jnp.max(jnp.abs(out - ref)))
    print("KERNEL_OK")
</pallas_src>

<mosaic_0001>
module attributes {stable_mosaic.version = 11 : i64} {
  func.func @kernel(%arg0: i32, %arg1: memref<16x8xf32, #tpu.memory_space<vmem>>, %arg2: memref<1x4x8x32xf32, #tpu.memory_space<vmem>>, %arg3: memref<1x8x8x8xf32, #tpu.memory_space<vmem>>) attributes {dimension_semantics = [#tpu.dimension_semantics<parallel>], iteration_bounds = array<i64: 2>, scalar_prefetch = 0 : i64, scratch_operands = 0 : i64, tpu.core_type = #tpu.core_type<tc>, window_params = [{pipeline_mode = #tpu.pipeline_mode<synchronous>, transform_indices = @transform_0, window_bounds = array<i64: 16, 8>}, {transform_indices = @transform_1, window_bounds = array<i64: 1, 4, 8, 32>}, {transform_indices = @transform_2, window_bounds = array<i64: 1, 8, 8, 8>}]} {
    %c0 = arith.constant 0 : index
    %c0_0 = arith.constant 0 : index
    %c0_1 = arith.constant 0 : index
    %c0_2 = arith.constant 0 : index
    %0 = vector.load %arg2[%c0, %c0_0, %c0_1, %c0_2] : memref<1x4x8x32xf32, #tpu.memory_space<vmem>>, vector<1x4x8x32xf32>
    %1 = vector.extract_strided_slice %0 {offsets = [0, 0, 0, 0], sizes = [1, 4, 8, 16], strides = [1, 1, 1, 1]} : vector<1x4x8x32xf32> to vector<1x4x8x16xf32>
    %2 = vector.shape_cast %1 : vector<1x4x8x16xf32> to vector<32x16xf32>
    %c0_3 = arith.constant 0 : index
    %c0_4 = arith.constant 0 : index
    %3 = vector.load %arg1[%c0_3, %c0_4] : memref<16x8xf32, #tpu.memory_space<vmem>>, vector<16x8xf32>
    %cst = arith.constant dense<0.000000e+00> : vector<32x8xf32>
    %4 = tpu.matmul %2, %3, %cst {dimension_numbers = #tpu.dot_dimension_numbers<[1], [0], [0], [1], [0, 0, 1, 1], [], []>, precision = #tpu.contract_precision<fp32>} : vector<32x16xf32>, vector<16x8xf32>, vector<32x8xf32> -> vector<32x8xf32>
    %5 = vector.shape_cast %4 : vector<32x8xf32> to vector<1x4x8x8xf32>
    %cst_5 = arith.constant 0.000000e+00 : f32
    %6 = vector.broadcast %cst_5 : f32 to vector<1x2x8x8xf32>
    %c0_6 = arith.constant 0 : index
    %c0_7 = arith.constant 0 : index
    %c0_8 = arith.constant 0 : index
    %c0_9 = arith.constant 0 : index
    %7 = vector.load %arg3[%c0_6, %c0_7, %c0_8, %c0_9] : memref<1x8x8x8xf32, #tpu.memory_space<vmem>>, vector<1x2x8x8xf32>
    tpu.vector_store %arg3[%c0_6, %c0_7, %c0_8, %c0_9], %6 {strides = array<i32>} : memref<1x8x8x8xf32, #tpu.memory_space<vmem>>, vector<1x2x8x8xf32>,
    %c0_10 = arith.constant 0 : index
    %c6 = arith.constant 6 : index
    %c0_11 = arith.constant 0 : index
    %c0_12 = arith.constant 0 : index
    %8 = vector.load %arg3[%c0_10, %c6, %c0_11, %c0_12] : memref<1x8x8x8xf32, #tpu.memory_space<vmem>>, vector<1x2x8x8xf32>
    tpu.vector_store %arg3[%c0_10, %c6, %c0_11, %c0_12], %6 {strides = array<i32>} : memref<1x8x8x8xf32, #tpu.memory_space<vmem>>, vector<1x2x8x8xf32>,
    %c0_13 = arith.constant 0 : index
    %c2 = arith.constant 2 : index
    %c0_14 = arith.constant 0 : index
    %c0_15 = arith.constant 0 : index
    %9 = vector.load %arg3[%c0_13, %c2, %c0_14, %c0_15] : memref<1x8x8x8xf32, #tpu.memory_space<vmem>>, vector<1x4x8x8xf32>
    tpu.vector_store %arg3[%c0_13, %c2, %c0_14, %c0_15], %5 {strides = array<i32>} : memref<1x8x8x8xf32, #tpu.memory_space<vmem>>, vector<1x4x8x8xf32>,
    return
  }
  func.func @transform_0(%arg0: i32) -> (i32, i32) {
    %c0_i32 = arith.constant 0 : i32
    %c0_i32_0 = arith.constant 0 : i32
    %c0_i32_1 = arith.constant 0 : i32
    return %c0_i32, %c0_i32_0 : i32, i32
  }
  func.func @transform_1(%arg0: i32) -> (i32, i32, i32, i32) {
    %c0_i32 = arith.constant 0 : i32
    %c0_i32_0 = arith.constant 0 : i32
    %c0_i32_1 = arith.constant 0 : i32
    %c0_i32_2 = arith.constant 0 : i32
    return %arg0, %c0_i32, %c0_i32_0, %c0_i32_1 : i32, i32, i32, i32
  }
  func.func @transform_2(%arg0: i32) -> (i32, i32, i32, i32) {
    %c0_i32 = arith.constant 0 : i32
    %c0_i32_0 = arith.constant 0 : i32
    %c0_i32_1 = arith.constant 0 : i32
    %c0_i32_2 = arith.constant 0 : i32
    return %arg0, %c0_i32, %c0_i32_0, %c0_i32_1 : i32, i32, i32, i32
  }
}

</mosaic_0001>

<bundles_post_ra>
// kernel: _lambda_call.1
= control target key start
LH: loop header
LB: loop body
LE: loop exit
PB: predicated region body
PF: predicated region fallthrough
CT: control target
= control target key end

     0   :  { %7 = vsyncpa [#allocation3], 0  ;;  %s1250_s0 = inlined_call_operand.vmem [shape: f32[16,8], index: 0, kind: input, shape index: {}]   ;;  %s1251_s1 = inlined_call_operand.vmem [shape: f32[2,4,8,32], index: 1, kind: input, shape index: {}]   ;;  %s1252_s2 = inlined_call_operand.hbm [shape: f32[2,8,8,8], index: 2, kind: output, shape index: {}]  }
   0x1   :  { %9 = vsyncpa [#allocation3 + $0x1], 0  ;;  %s1121_s9 = smov 0   ;;  %s1123_s10 = smov 0  }
   0x2   :  { %s1125_s11 = smov 0   ;;  %s1127_s12 = smov 0  }
   0x3 LB: > { %s1142_s13 = sadd.s32 4294967295, %s1100_s12   ;;  %s836_s14 = sadd.s32 4294967294, %s1100_s12   ;;  %s1100_s12 = sphi %s1127_s12, %s1258_s12   ;;  %s1096_s11 = sphi %s1125_s11, %s1257_s11   ;;  %s1092_s10 = sphi %s1123_s10, %s1256_s10   ;;  %s1088_s9 = sphi %s1121_s9, %s1255_s9  }
   0x4   : > { %s1146_s15 = sadd.s32 1, %s1100_s12   ;;  %s69_s16 = sadd.s32 1, %s1096_s11 }
   0x5   : > { %s66_s17 = ssub.s32 %s1100_s12, %s1146_s15  ;;  %p79_p0 = scmp.ne.s32.totalorder %s1096_s11, %s1092_s10 }
   0x6   : > { %p67_p1 = scmp.eq.s32.totalorder %s66_s17, 0  ;;  %p80_p2 = scmp.eq.s32.totalorder %s1142_s13, 1 }
   0x7   : > { %p85_p3 = scmp.ne.s32.totalorder %s1092_s10, %s1088_s9  ;;  %p86_p4 = scmp.eq.s32.totalorder %s836_s14, 1 }
   0x8   : > { %s1157_s18 = scalar_select %p67_p1, %s1096_s11, %s69_s16  }
   0x9   : > { %p1159_p5 = por %p80_p2, %p79_p0  ;;  %p1163_p6 = por %p86_p4, %p85_p3 }
   0xa   : > { %p839_p7 = scmp.ge.s32.totalorder %s1100_s12, 1  ;;  %p115_p8 = scmp.lt.s32.totalorder %s1100_s12, 3 }
   0xc   : > { %p116_p9 = pnand %p839_p7, %p115_p8 }
   0xd   : > { %v146_v0 = vld [vmem:[%s1250_s0] sm:$0xff] (!%p116_p9)  ;;  %v147_v1 = vld [vmem:[%s1250_s0 + $0x8] sm:$0xff] (!%p116_p9)  ;;  %p137_p10 = scmp.lt.s32.totalorder (!%p116_p9), %s1142_s13, 1  ;;  %vm148_vm0 = vcmask (!%p116_p9), 130048   ;;  %s134_s30 = sand.u32 (!%p116_p9), 1, %s1092_s10   ;;  %vm749_vm1 = vcmask (!%p116_p9), 64512  }
   0xe   : > { %119 = sbr.rel (%p116_p9) target bundleno = 288 (0x120), region = 28  ;;  %v162_v2 = vand.u32 (!%p116_p9), 4294901760, %v146_v0  ;;  %v165_v3 = vand.u32 (!%p116_p9), 4294901760, %v147_v1  ;;  %s840_s3 = sshll.u32 (!%p116_p9), %s134_s30, 6  ;;  %v1102_v44 = vmov (!%p116_p9), 0.0  }
   0xf   : > { %s136_s4 = scalar_lea.vmem (!%p116_p9), [#allocation2], %s840_s3  ;;  %s855_s5 = sshll.u32 (!%p116_p9), %s1142_s13, 10 }
  0x10   : > { %v1177_v4 = vpack.c.bf16 (!%p116_p9), %v165_v3, %v162_v2  ;;  %v270_v5 = vsub.f32 (!%p116_p9), %v146_v0, %v162_v2  ;;  %v277_v6 = vsub.f32 (!%p116_p9), %v147_v1, %v165_v3  ;;  %750 = vst.msk [vmem:[%s136_s4] sm:$0xff] (!%p116_p9), %vm749_vm1, %v1102_v44  ;;  %751 = vst.msk [vmem:[%s136_s4 + $0x8] sm:$0xff] (!%p116_p9), %vm749_vm1, %v1102_v44  ;;  %s774_s6 = sshll.u32 (!%p116_p9), %s136_s4, 4  ;;  %s1203_s14 = scalar_lea.hbm (!%p116_p9), %s1252_s2, %s855_s5  ;;  %s1205_s6 = int_to_ptr.vmem [resolvable:$true] %s774_s6 }
  0x11   : > { %843 = vst.msk [vmem:[%s136_s4 + $0x30] sm:$0xff] (!%p116_p9), %vm749_vm1, %v1102_v44  ;;  %844 = vst.msk [vmem:[%s136_s4 + $0x38] sm:$0xff] (!%p116_p9), %vm749_vm1, %v1102_v44  ;;  %s1038_s16 = scalar_lea.vmem (!%p116_p9), %s1205_s6, 1024  ;;  %s1103_s17 = smov (!%p116_p9), [#allocation2]  }
  0x12   : > { %965 = vmatprep.subr.bf16.mxu0 (!%p116_p9), %v1177_v4  ;;  %953 = vmatprep.subr.bf16.mxu1 (!%p116_p9), %v1177_v4  ;;  %v271_v7 = vand.u32 (!%p116_p9), 4294901760, %v270_v5  ;;  %v278_v8 = vand.u32 (!%p116_p9), 4294901760, %v277_v6  ;;  %v960_v42 = vpack.c.bf16 (!%p116_p9), %v277_v6, %v270_v5  ;;  %p1039_p11 = scmp.ne.s32.totalorder (!%p116_p9), %s1205_s6, %s1038_s16  ;;  %s1042_s21 = sshll.u32 (!%p116_p9), %s1103_s17, 4  ;;  %s1043_s21 = int_to_ptr.vmem [resolvable:$false] %s1042_s21 }
  0x13   : > { %967 = vmatpush3.bf16.msra.mxu0 (!%p116_p9), %v1177_v4  ;;  %955 = vmatpush3.bf16.msra.mxu1 (!%p116_p9), %v1177_v4  ;;  %s1044_s22 = scalar_lea.vmem (!%p116_p9), %s1043_s21, 2048  ;;  %p1045_p0 = scmp.lt.s32.totalorder (!%p116_p9), %s1205_s6, %s1043_s21 }
  0x14   : > { %v272_v14 = vsub.f32 (!%p116_p9), %v270_v5, %v271_v7  ;;  %v279_v15 = vsub.f32 (!%p116_p9), %v277_v6, %v278_v8  ;;  %v968_v20 = vpack.c.bf16 (!%p116_p9), %v278_v8, %v271_v7  ;;  %p1040_p12 = pnand (!%p116_p9), %p1039_p11, %p1159_p5  ;;  %p1046_p1 = scmp.lt.s32.totalorder (!%p116_p9), %s1044_s22, %s1038_s16 }
  0x15   : > { %s138_s25 = scalar_select %p137_p10, %s1142_s13, 1 }
  0x16   : > { %v273_v21 = vand.u32 4294901760, %v272_v14  ;;  %v280_v22 = vand.u32 4294901760, %v279_v15  ;;  %969 = vmatprep.subr.bf16.mxu0 %v968_v20  ;;  %s1209_s13 = scalar_lea.sflag [#allocation3], %s134_s30  ;;  %p1041_p13 = pneg %p1040_p12 }
  0x17   : > { %s854_s26 = sshll.u32 %s138_s25, 5  ;;  %p1047_p2 = por %p1046_p1, %p1045_p0 }
  0x18   : > { %s141_s29 = scalar_lea.vmem %s1251_s1, %s854_s26  ;;  %v956_v28 = vpack.c.bf16 %v280_v22, %v273_v21 }
  0x19   : > { %v142_v9 = vld [vmem:[%s141_s29] sm:$0xff]  ;;  %v143_v10 = vld [vmem:[%s141_s29 + $0x8] sm:$0xff]  ;;  %v144_v11 = vld [vmem:[%s141_s29 + $0x10] sm:$0xff]  ;;  %p1048_p3 = pnand %p1047_p2, %p1041_p13 }
  0x1a   : > { %v150_v12 = vsel %vm148_vm0, %v142_v9, 0  ;;  %v153_v13 = vsel %vm148_vm0, %v143_v10, 0  ;;  %v145_v16 = vld [vmem:[%s141_s29 + $0x18] sm:$0xff]  ;;  %v156_v19 = vsel %vm148_vm0, %v144_v11, 0  ;;  %957 = vmatprep.subr.bf16.mxu1 %v956_v28 }
  0x1b   : > { %v228_v17 = vand.u32 4294901760, %v150_v12  ;;  %v238_v18 = vand.u32 4294901760, %v153_v13  ;;  %v248_v23 = vand.u32 4294901760, %v156_v19  ;;  %v159_v24 = vsel %vm148_vm0, %v145_v16, 0 }
  0x1c   : > { %v258_v27 = vand.u32 4294901760, %v159_v24 }
  0x1d   : > { %v229_v25 = vsub.f32 %v150_v12, %v228_v17  ;;  %v239_v26 = vsub.f32 %v153_v13, %v238_v18  ;;  %v249_v29 = vsub.f32 %v156_v19, %v248_v23 }
  0x1e   : > { %v259_v32 = vsub.f32 %v159_v24, %v258_v27 }
  0x1f   : > { %v230_v30 = vand.u32 4294901760, %v229_v25  ;;  %v240_v31 = vand.u32 4294901760, %v239_v26  ;;  %v250_v33 = vand.u32 4294901760, %v249_v29 }
  0x20   : > { %v260_v36 = vand.u32 4294901760, %v259_v32 }
  0x21   : > { %926 = vmatprep.mubr.f32.mxu0 %v230_v30  ;;  %v231_v34 = vsub.f32 %v229_v25, %v230_v30  ;;  %v241_v35 = vsub.f32 %v239_v26, %v240_v31  ;;  %v251_v37 = vsub.f32 %v249_v29, %v250_v33 }
  0x22   : > { %927 = vmatmul.mubr.f32.vlgmr.msra.gmra.mrb[0].mxu0 %v240_v31  ;;  %v261_v40 = vsub.f32 %v259_v32, %v260_v36 }
  0x23   : > { %v232_v38 = vand.u32 4294901760, %v231_v34  ;;  %929 = vmatprep.mubr.f32.mxu0 %v250_v33  ;;  %v242_v39 = vand.u32 4294901760, %v241_v35  ;;  %971 = vmatpush3.bf16.msra.mxu0 %v968_v20  ;;  %v252_v41 = vand.u32 4294901760, %v251_v37 }
  0x24   : > { %973 = vmatprep.subr.bf16.mxu0 %v1177_v4  ;;  %v262_v43 = vand.u32 4294901760, %v261_v40 }
  0x25   : > { %896 = vmatprep.mubr.f32.mxu1 %v232_v38 }
  0x26   : > { %897 = vmatmul.mubr.f32.vlgmr.msra.gmra.mrb[0].mxu1 %v242_v39  ;;  %930 = vmatmul.mubr.f32.gmra.mrb[2].mxu0 %v260_v36 }
  0x27   : > { %959 = vmatpush3.bf16.msra.mxu1 %v956_v28  ;;  %899 = vmatprep.mubr.f32.mxu1 %v252_v41 }
  0x28   : > { %936 = vmatprep.mubr.f32.mxu0 %v228_v17  ;;  %961 = vmatprep.subr.bf16.mxu1 %v960_v42 }
  0x2a   : > { %900 = vmatmul.mubr.f32.gmra.mrb[2].mxu1 %v262_v43  ;;  %937 = vmatmul.mubr.f32.vlgmr.msra.gmra.mrb[0].mxu0 %v238_v18 }
  0x2b   : > { %906 = vmatprep.mubr.f32.mxu1 %v228_v17  ;;  %939 = vmatprep.mubr.f32.mxu0 %v248_v23 }
  0x2c   : > { %975 = vmatpush3.bf16.msra.mxu0 %v1177_v4 }
  0x2e   : > { %907 = vmatmul.mubr.f32.vlgmr.msra.gmra.mrb[0].mxu1 %v238_v18  ;;  %940 = vmatmul.mubr.f32.gmra.mrb[2].mxu0 %v258_v27 }
  0x2f   : > { %963 = vmatpush3.bf16.msra.mxu1 %v960_v42  ;;  %909 = vmatprep.mubr.f32.mxu1 %v248_v23 }
  0x30   : > { %946 = vmatprep.mubr.f32.mxu0 %v228_v17 }
  0x32   : > { %910 = vmatmul.mubr.f32.gmra.mrb[2].mxu1 %v258_v27  ;;  %947 = vmatmul.mubr.f32.vlgmr.msra.gmra.mrb[0].mxu0 %v238_v18 }
  0x33   : > { %916 = vmatprep.mubr.f32.mxu1 %v229_v25  ;;  %949 = vmatprep.mubr.f32.mxu0 %v248_v23 }
  0x36   : > { %917 = vmatmul.mubr.f32.vlgmr.msra.gmra.mrb[0].mxu1 %v239_v26  ;;  %950 = vmatmul.mubr.f32.gmra.mrb[2].mxu0 %v258_v27 }
  0x37   : > { %919 = vmatprep.mubr.f32.mxu1 %v249_v29 }
  0x3a   : > { %920 = vmatmul.mubr.f32.gmra.mrb[2].mxu1 %v259_v32 }
 0x105   : > { %v948_v45 = vpop.f32.mrb[0].mxu0 }
 0x106   : > { %v727_v46 = vpop.f32.mrb[1].mxu0 }
 0x109   : > { %v918_v47 = vpop.f32.mrb[0].mxu1  ;;  %v951_v48 = vpop.f32.mrb[2].mxu0 }
 0x10a   : > { %v976_v49 = vadd.f32 %v948_v45, %v918_v47  ;;  %v439_v50 = vpop.f32.mrb[1].mxu1  ;;  %v739_v51 = vpop.f32.mrb[3].mxu0 }
 0x10b   : > { %v977_v52 = vadd.f32 %v727_v46, %v439_v50 }
 0x10c   : > { %846 = vst.msk [vmem:[%s136_s4 + $0x18] sm:$0xff] %vm749_vm1, %v976_v49 }
 0x10d   : > { %845 = vst.msk [vmem:[%s136_s4 + $0x10] sm:$0xff] %vm749_vm1, %v977_v52  ;;  %v921_v53 = vpop.f32.mrb[2].mxu1 }
 0x10e   : > { %v978_v54 = vadd.f32 %v951_v48, %v921_v53  ;;  %v453_v55 = vpop.f32.mrb[3].mxu1 }
 0x10f   : > { %v979_v56 = vadd.f32 %v739_v51, %v453_v55 }
 0x110   : > { %848 = vst.msk [vmem:[%s136_s4 + $0x28] sm:$0xff] %vm749_vm1, %v978_v54 }
 0x111   : > { %847 = vst.msk [vmem:[%s136_s4 + $0x20] sm:$0xff] %vm749_vm1, %v979_v56 }
 0x112   : > { %1051 = shalt.err (!%p1048_p3)
}
 0x113   : > { %s1052_s23 = scalar_lea.hbm %s1203_s14, 1024  ;;  %s1056_s26 = scalar_lea.hbm %s1252_s2, 2048 }
 0x114   : > { %p1053_p4 = scmp.ne.s32.totalorder %s1203_s14, %s1052_s23  ;;  %p1057_p9 = scmp.lt.u32.totalorder %s1203_s14, %s1252_s2 }
 0x115   : > { %p1058_p10 = scmp.lt.u32.totalorder %s1056_s26, %s1052_s23  ;;  %p1060_p12 = scmp.lt.u32.totalorder %s1052_s23, %s1203_s14 }
 0x116   : > { %p1054_p7 = pnand %p1053_p4, %p1159_p5 }
 0x117   : > { %p1059_p11 = por %p1058_p10, %p1057_p9 }
 0x118   : > { %p1055_p8 = pneg %p1054_p7 }
 0x119   : > { %p1061_p13 = por %p1060_p12, %p1059_p11 }
 0x11b   : > { %p1062_p0 = pnand %p1061_p13, %p1055_p8 }
 0x11d   : > { %1065 = shalt.err (!%p1062_p0)
}
 0x11e   : > { %s1104_s29 = smov 128   ;;  %s1105_s30 = smov 8  }
 0x11f   : > { %996 = dma.vmem_to_hbm [thread:$0]  (%p1159_p5), %s1205_s6, 1024, %s1203_s14, %s1209_s13, %s1104_s29, %s1104_s29, %s1105_s30  }
 0x120 PF: > { %p1002_p1 = scmp.ge.s32.totalorder %s1100_s12, 2  ;;  %s789_s3 = sand.u32 1, %s1088_s9  }
 0x121   : > { %s790_s4 = scalar_lea.sflag [#allocation3], %s789_s3 }
 0x122   : > { %p999_p2 = pnand %p1002_p1, %p1163_p6 }
 0x124   : > { %1083 = dma.done.wait (!%p999_p2), %s790_s4, 1024  }
 0x125   : > { %1085 = vsyncadd (!%p999_p2), %s790_s4, 4294966272  ;;  %p12_p3 = scmp.ge.s32.totalorder %s1146_s15, 4   ;;  %s1255_s9 = smov %s1092_s10 }
 0x126   : > { %s1256_s10 = smov %s1096_s11  ;;  %s1257_s11 = smov %s1157_s18 }
 0x127   : > { %s1258_s12 = smov %s1146_s15  ;;  %14 = sbr.rel (!%p12_p3) target bundleno = 3 (0x3), region = 65 }
 0x12e   :  { %795 = vsyncpa [#allocation3], 1 }
 0x12f   :  { %797 = vsyncpa [#allocation3 + $0x1], 1 }

</bundles_post_ra>
